<compile_context>
chip_gen: v7x
topology: tpu7x:2x2x1
jax: 0.10.0
libtpu: 0.0.40
codegen_flags: <defaults>
</compile_context>

<pallas_src>
import functools

import jax
import jax.numpy as jnp
from jax.experimental import pallas as pl
from jax.experimental.pallas import tpu as pltpu

_OUT_LANES = 128   # lane-dense output slab width
_SUBLANES = 16     # batch padding granularity (covers f32 and bf16 tiles)


def _style_classifier_kernel(x_ref, w1_ref, b1_ref, w2_ref, b2_ref, o_ref):
    # x_ref:  [TB, D]    (f32 or bf16 -- fed to the MXU as-is)
    # w1_ref: [D, H]     (same dtype as x)
    # b1_ref: [1, H]     f32
    # w2_ref: [H, 128]   f32, col0 = -(w2[:,1]-w2[:,0]), col1 = +(w2[:,1]-w2[:,0]), rest 0
    # b2_ref: [1, 128]   f32, col0 = -(b2[1]-b2[0]),     col1 = +(b2[1]-b2[0]),     rest 0
    # o_ref:  [TB, 128]  f32
    h = jnp.dot(x_ref[...], w1_ref[...], preferred_element_type=jnp.float32)
    h = jnp.maximum(h + b1_ref[...], 0.0)
    d = jnp.dot(h, w2_ref[...], preferred_element_type=jnp.float32) + b2_ref[...]
    # sigmoid(d) in cols 0/1 equals the 2-way softmax; padding cols are sliced
    # off in the wrapper.  exp goes to the EUP (separate bundle slot), the
    # exact reciprocal keeps <=1e-5 agreement with an f32 softmax reference.
    probs = pl.reciprocal(1.0 + jnp.exp(-d), approx=False)
    o_ref[...] = probs.astype(o_ref.dtype)


def _round_up(n, m):
    return -(-n // m) * m


@functools.partial(jax.jit, static_argnames=("block_b",))
def style_classifier_forward(x, w1, b1, w2, b2, *, block_b=256):
    """x: [1, B, D] (PyTorch convention). Returns [B, 2] float32 probabilities."""
    assert x.ndim == 3 and x.shape[0] == 1
    assert block_b % _SUBLANES == 0
    x2d = x[0]                              # [B, D] -- glue reshape outside the kernel
    B, D = x2d.shape
    H = w1.shape[1]

    # Fold Linear2 + 2-class softmax into a lane-dense sigmoid matmul.
    w2f = w2.astype(jnp.float32)
    b2f = b2.astype(jnp.float32).reshape(1, -1)
    d_w = w2f[:, 1] - w2f[:, 0]             # [H]
    d_b = b2f[0, 1] - b2f[0, 0]             # scalar
    w2_eff = jnp.zeros((H, _OUT_LANES), jnp.float32)
    w2_eff = w2_eff.at[:, 0].set(-d_w).at[:, 1].set(d_w)
    b2_eff = jnp.zeros((1, _OUT_LANES), jnp.float32)
    b2_eff = b2_eff.at[0, 0].set(-d_b).at[0, 1].set(d_b)
    b1f = b1.astype(jnp.float32).reshape(1, -1)   # [1, H]

    # Batch tiling: pad B to a sublane-friendly multiple of the block size.
    tb = min(block_b, _round_up(B, _SUBLANES))
    Bp = _round_up(B, tb)
    if Bp != B:
        x2d = jnp.pad(x2d, ((0, Bp - B), (0, 0)))
    grid_b = Bp // tb

    out = pl.pallas_call(
        _style_classifier_kernel,
        out_shape=jax.ShapeDtypeStruct((Bp, _OUT_LANES), jnp.float32),
        grid=(grid_b,),
        in_specs=[
            pl.BlockSpec((tb, D), lambda i: (i, 0)),            # activations: tiled over B
            pl.BlockSpec((D, H), lambda i: (0, 0)),             # weights stay VMEM-resident
            pl.BlockSpec((1, H), lambda i: (0, 0)),
            pl.BlockSpec((H, _OUT_LANES), lambda i: (0, 0)),
            pl.BlockSpec((1, _OUT_LANES), lambda i: (0, 0)),
        ],
        out_specs=pl.BlockSpec((tb, _OUT_LANES), lambda i: (i, 0)),
        compiler_params=pltpu.CompilerParams(
            dimension_semantics=("parallel",),   # v7x: shard batch tiles across both TCs
        ),
    )(x2d, w1, b1f, w2_eff, b2_eff)

    return out[:B, :2]


def init_params(key, input_dim):
    """Deterministic synthetic parameter init matching nn.Linear shapes."""
    hidden = int(input_dim * 0.5)
    k1, k2, k3, k4 = jax.random.split(key, 4)
    # Stored as [in, out] so the kernel does x @ W + b (== PyTorch x @ W.T + b).
    w1 = jax.random.normal(k1, (input_dim, hidden), jnp.float32) * (1.0 / input_dim**0.5)
    b1 = jax.random.normal(k2, (1, hidden), jnp.float32) * 0.01
    w2 = jax.random.normal(k3, (hidden, 2), jnp.float32) * (1.0 / hidden**0.5)
    b2 = jax.random.normal(k4, (1, 2), jnp.float32) * 0.01
    return w1, b1, w2, b2


def reference_forward(x, w1, b1, w2, b2):
    """Pure-JAX reference (mirrors the PyTorch module)."""
    h = jnp.maximum(x[0] @ w1 + b1, 0.0)
    logits = h @ w2 + b2
    return jax.nn.softmax(logits, axis=-1)


if __name__ == "__main__":
    batch_size = 2
    input_dim = 32   # Style_dim

    key = jax.random.PRNGKey(0)
    kx, kp, kb = jax.random.split(key, 3)
    x = jax.random.normal(kx, (1, batch_size, input_dim), jnp.float32)
    w1, b1, w2, b2 = init_params(kp, input_dim)

    # --- f32 path: matches the PyTorch module semantics ---
    out = jax.block_until_ready(style_classifier_forward(x, w1, b1, w2, b2))
    ref = reference_forward(x, w1, b1, w2, b2)
    assert out.shape == (batch_size, 2), out.shape
    assert jnp.allclose(out, ref, atol=1e-5, rtol=1e-5), (out, ref)
    assert jnp.allclose(jnp.sum(out, axis=-1), 1.0, atol=1e-5)

    # --- bf16 activations/weights, f32 MXU accumulation (halves DMA volume) ---
    x_bf, w1_bf = x.astype(jnp.bfloat16), w1.astype(jnp.bfloat16)
    out_bf = jax.block_until_ready(style_classifier_forward(x_bf, w1_bf, b1, w2, b2))
    ref_bf = reference_forward(
        x_bf.astype(jnp.float32), w1_bf.astype(jnp.float32), b1, w2, b2)
    assert jnp.allclose(out_bf, ref_bf, atol=1e-4, rtol=1e-4), (out_bf, ref_bf)

    # --- multi-tile grid path (exercises batch padding + resident weights) ---
    x_big = jax.random.normal(kb, (1, 20, input_dim), jnp.float32)
    out_big = jax.block_until_ready(
        style_classifier_forward(x_big, w1, b1, w2, b2, block_b=16))
    ref_big = reference_forward(x_big, w1, b1, w2, b2)
    assert out_big.shape == (20, 2), out_big.shape
    assert jnp.allclose(out_big, ref_big, atol=1e-5, rtol=1e-5)

    print("KERNEL_OK")
</pallas_src>

<mosaic_0001>
module attributes {stable_mosaic.version = 11 : i64} {
  func.func @_style_classifier_kernel(%arg0: i32, %arg1: memref<16x32xf32, #tpu.memory_space<vmem>>, %arg2: memref<32x16xf32, #tpu.memory_space<vmem>>, %arg3: memref<1x16xf32, #tpu.memory_space<vmem>>, %arg4: memref<16x128xf32, #tpu.memory_space<vmem>>, %arg5: memref<1x128xf32, #tpu.memory_space<vmem>>, %arg6: memref<16x128xf32, #tpu.memory_space<vmem>>) attributes {dimension_semantics = [#tpu.dimension_semantics<parallel>], iteration_bounds = array<i64: 1>, scalar_prefetch = 0 : i64, scratch_operands = 0 : i64, tpu.core_type = #tpu.core_type<tc>, window_params = [{transform_indices = @transform_0, window_bounds = array<i64: 16, 32>}, {pipeline_mode = #tpu.pipeline_mode<synchronous>, transform_indices = @transform_1, window_bounds = array<i64: 32, 16>}, {pipeline_mode = #tpu.pipeline_mode<synchronous>, transform_indices = @transform_2, window_bounds = array<i64: 1, 16>}, {pipeline_mode = #tpu.pipeline_mode<synchronous>, transform_indices = @transform_3, window_bounds = array<i64: 16, 128>}, {pipeline_mode = #tpu.pipeline_mode<synchronous>, transform_indices = @transform_4, window_bounds = array<i64: 1, 128>}, {transform_indices = @transform_5, window_bounds = array<i64: 16, 128>}]} {
    %c0 = arith.constant 0 : index
    %c0_0 = arith.constant 0 : index
    %0 = vector.load %arg1[%c0, %c0_0] : memref<16x32xf32, #tpu.memory_space<vmem>>, vector<16x32xf32>
    %c0_1 = arith.constant 0 : index
    %c0_2 = arith.constant 0 : index
    %1 = vector.load %arg2[%c0_1, %c0_2] : memref<32x16xf32, #tpu.memory_space<vmem>>, vector<32x16xf32>
    %cst = arith.constant dense<0.000000e+00> : vector<16x16xf32>
    %2 = tpu.matmul %0, %1, %cst {dimension_numbers = #tpu.dot_dimension_numbers<[1], [0], [0], [1], [0, 0, 1, 1], [], []>} : vector<16x32xf32>, vector<32x16xf32>, vector<16x16xf32> -> vector<16x16xf32>
    %c0_3 = arith.constant 0 : index
    %c0_4 = arith.constant 0 : index
    %3 = vector.load %arg3[%c0_3, %c0_4] : memref<1x16xf32, #tpu.memory_space<vmem>>, vector<1x16xf32>
    %4 = vector.broadcast %3 : vector<1x16xf32> to vector<16x16xf32>
    %5 = arith.addf %2, %4 : vector<16x16xf32>
    %cst_5 = arith.constant 0.000000e+00 : f32
    %6 = vector.broadcast %cst_5 : f32 to vector<16x16xf32>
    %7 = arith.maximumf %5, %6 : vector<16x16xf32>
    %c0_6 = arith.constant 0 : index
    %c0_7 = arith.constant 0 : index
    %8 = vector.load %arg4[%c0_6, %c0_7] : memref<16x128xf32, #tpu.memory_space<vmem>>, vector<16x128xf32>
    %cst_8 = arith.constant dense<0.000000e+00> : vector<16x128xf32>
    %9 = tpu.matmul %7, %8, %cst_8 {dimension_numbers = #tpu.dot_dimension_numbers<[1], [0], [0], [1], [0, 0, 1, 1], [], []>} : vector<16x16xf32>, vector<16x128xf32>, vector<16x128xf32> -> vector<16x128xf32>
    %c0_9 = arith.constant 0 : index
    %c0_10 = arith.constant 0 : index
    %10 = vector.load %arg5[%c0_9, %c0_10] : memref<1x128xf32, #tpu.memory_space<vmem>>, vector<1x128xf32>
    %11 = vector.broadcast %10 : vector<1x128xf32> to vector<16x128xf32>
    %12 = arith.addf %9, %11 : vector<16x128xf32>
    %cst_11 = arith.constant 0.000000e+00 : f32
    %13 = vector.broadcast %cst_11 : f32 to vector<16x128xf32>
    %14 = arith.subf %13, %12 : vector<16x128xf32>
    %15 = math.exp %14 : vector<16x128xf32>
    %cst_12 = arith.constant 1.000000e+00 : f32
    %16 = vector.broadcast %cst_12 : f32 to vector<16x128xf32>
    %17 = arith.addf %16, %15 : vector<16x128xf32>
    %18 = tpu.reciprocal %17 : vector<16x128xf32> -> vector<16x128xf32>
    %c0_13 = arith.constant 0 : index
    %c0_14 = arith.constant 0 : index
    %19 = vector.load %arg6[%c0_13, %c0_14] : memref<16x128xf32, #tpu.memory_space<vmem>>, vector<16x128xf32>
    tpu.vector_store %arg6[%c0_13, %c0_14], %18 {strides = array<i32>} : memref<16x128xf32, #tpu.memory_space<vmem>>, vector<16x128xf32>,
    return
  }
  func.func @transform_0(%arg0: i32) -> (i32, i32) {
    %c0_i32 = arith.constant 0 : i32
    %c0_i32_0 = arith.constant 0 : i32
    return %arg0, %c0_i32 : i32, i32
  }
  func.func @transform_1(%arg0: i32) -> (i32, i32) {
    %c0_i32 = arith.constant 0 : i32
    %c0_i32_0 = arith.constant 0 : i32
    %c0_i32_1 = arith.constant 0 : i32
    return %c0_i32, %c0_i32_0 : i32, i32
  }
  func.func @transform_2(%arg0: i32) -> (i32, i32) {
    %c0_i32 = arith.constant 0 : i32
    %c0_i32_0 = arith.constant 0 : i32
    %c0_i32_1 = arith.constant 0 : i32
    return %c0_i32, %c0_i32_0 : i32, i32
  }
  func.func @transform_3(%arg0: i32) -> (i32, i32) {
    %c0_i32 = arith.constant 0 : i32
    %c0_i32_0 = arith.constant 0 : i32
    %c0_i32_1 = arith.constant 0 : i32
    return %c0_i32, %c0_i32_0 : i32, i32
  }
  func.func @transform_4(%arg0: i32) -> (i32, i32) {
    %c0_i32 = arith.constant 0 : i32
    %c0_i32_0 = arith.constant 0 : i32
    %c0_i32_1 = arith.constant 0 : i32
    return %c0_i32, %c0_i32_0 : i32, i32
  }
  func.func @transform_5(%arg0: i32) -> (i32, i32) {
    %c0_i32 = arith.constant 0 : i32
    %c0_i32_0 = arith.constant 0 : i32
    return %arg0, %c0_i32 : i32, i32
  }
}

</mosaic_0001>

<bundles_post_ra>
// kernel: style_classifier_forward.1
= control target key start
LH: loop header
LB: loop body
LE: loop exit
PB: predicated region body
PF: predicated region fallthrough
CT: control target
= control target key end

     0   :  { %vm33_vm0 = vcmask 261120   ;;  %vm126_vm1 = vcmask 130048   ;;  %s344_s1 = inlined_call_operand.vmem [shape: f32[32,16], index: 1, kind: input, shape index: {}]   ;;  %s345_s0 = inlined_call_operand.vmem [shape: f32[16,32], index: 0, kind: input, shape index: {}]   ;;  %s346_s3 = inlined_call_operand.vmem [shape: f32[16,128], index: 3, kind: input, shape index: {}]   ;;  %s347_s2 = inlined_call_operand.vmem [shape: f32[1,16], index: 2, kind: input, shape index: {}]   ;;  %s348_s4 = inlined_call_operand.vmem [shape: f32[1,128], index: 4, kind: input, shape index: {}]   ;;  %s349_s5 = inlined_call_operand.vmem [shape: f32[16,128], index: 5, kind: output, shape index: {}]  }
   0x1   :  { %v22_v0 = vld [vmem:[%s344_s1] sm:$0xff]  ;;  %v23_v1 = vld [vmem:[%s344_s1 + $0x8] sm:$0xff]  ;;  %v24_v2 = vld [vmem:[%s344_s1 + $0x10] sm:$0xff] }
   0x2   :  { %v258_v3 = vpack.c.bf16 %v23_v1, %v22_v0  ;;  %v25_v4 = vld [vmem:[%s344_s1 + $0x18] sm:$0xff]  ;;  %v20_v5 = vld [vmem:[%s345_s0] sm:$0xff]  ;;  %v21_v7 = vld [vmem:[%s345_s0 + $0x8] sm:$0xff] }
   0x3   :  { %v262_v6 = vpack.c.bf16 %v25_v4, %v24_v2  ;;  %248 = vmatprep.mubr.msk.f32.mxu0 %vm33_vm0, %v20_v5  ;;  %v117_v8 = vld [vmem:[%s346_s3] sm:$0xff]  ;;  %v118_v9 = vld [vmem:[%s346_s3 + $0x8] sm:$0xff] }
   0x4   :  { %259 = vmatprep.subr.bf16.mxu0 %v258_v3  ;;  %v266_v10 = vpack.c.bf16 %v118_v9, %v117_v8  ;;  %v224_v11 = vld [vmem:[%s347_s2] ss:$0 sm:$0xff] }
   0x5   :  { %261 = vmatpush3.bf16.msra.mxu0 %v258_v3  ;;  %v227_v18 = vld [vmem:[%s348_s4] ss:$0 sm:$0xff] }
   0x6   :  { %263 = vmatprep.subr.bf16.mxu0 %v262_v6  ;;  %267 = vmatprep.subr.bf16.mxu1 %v266_v10 }
   0x7   :  { %269 = vmatpush3.bf16.msra.mxu1 %v266_v10 }
   0x9   :  { %265 = vmatpush3.bf16.msra.mxu0 %v262_v6 }
   0xc   :  { %249 = vmatmul.mubr.msk.f32.vlgmr.msra.gmra.mrb[0].mxu0 %vm33_vm0, %v21_v7 }
  0xdf   :  { %v250_v12 = vpop.f32.mrb[0].mxu0 }
  0xe0   :  { %v112_v13 = vadd.f32 %v250_v12, %v224_v11  ;;  %v106_v14 = vpop.f32.mrb[1].mxu0 }
  0xe1   :  { %v107_v15 = vadd.f32 %v224_v11, %v106_v14 }
  0xe2   :  { %v116_v17 = vmax.f32 %v112_v13, 0.0 }
  0xe3   :  { %v115_v16 = vmax.f32 %v107_v15, 0.0 }
  0xe5   :  { %255 = vmatprep.mubr.msk.f32.mxu1 %vm126_vm1, %v115_v16 }
  0xe6   :  { %256 = vmatmul.mubr.msk.f32.vlgmr.msra.gmra.mrb[0].mxu1 %vm126_vm1, %v116_v17 }
 0x1b9   :  { %v257_v19 = vpop.f32.mrb[0].mxu1 }
 0x1ba   :  { %v205_v20 = vadd.f32 %v257_v19, %v227_v18  ;;  %v199_v21 = vpop.f32.mrb[1].mxu1 }
 0x1bb   :  { %v200_v22 = vadd.f32 %v227_v18, %v199_v21 }
 0x1bc   :  { %v209_v23 = vsub.f32 0.0, %v205_v20 }
 0x1bd   :  { %v208_v24 = vsub.f32 0.0, %v200_v22 }
 0x1be   :  { %v212_v25 = vmul.f32 1.442695, %v209_v23 }
 0x1bf   :  { %v210_v26 = vmul.f32 1.442695, %v208_v24 }
 0x1c0   :  { %270 = vpow2.f32 %v212_v25 }
 0x1c1   :  { %272 = vpow2.f32 %v210_v26 }
 0x1ca   :  { %v271_v27 = vpop.eup %270 }
 0x1cb   :  { %v273_v28 = vpop.eup %272  ;;  %v215_v29 = vadd.f32 1.0, %v271_v27 }
 0x1cc   :  { %v214_v30 = vadd.f32 1.0, %v273_v28 }
 0x1cd   :  { %274 = vrcp.f32 %v215_v29 }
 0x1ce   :  { %276 = vrcp.f32 %v214_v30 }
 0x1d7   :  { %v275_v31 = vpop.eup %274 }
 0x1d8   :  { %v277_v32 = vpop.eup %276  ;;  %219 = vst [vmem:[%s349_s5 + $0x8] sm:$0xff] %v275_v31 }
 0x1d9   :  { %218 = vst [vmem:[%s349_s5] sm:$0xff] %v277_v32 }

</bundles_post_ra>
